<compile_context>
chip_gen: v7x
topology: tpu7x:2x2x1
jax: 0.10.0
libtpu: 0.0.40
codegen_flags: <defaults>
</compile_context>

<pallas_src>
import math
from functools import partial

import jax
import jax.numpy as jnp
from jax.experimental import pallas as pl
from jax.experimental.pallas import tpu as pltpu


def _round_up(v, m):
    return ((v + m - 1) // m) * m


def _attention_kernel(x_ref, w_ref, mask_ref, o_ref, *, dkp, dvp):
    """One grid step = bt batch rows, fully resident in VMEM."""
    bt, T, D = x_ref.shape
    E = 2 * dkp + dvp

    # Fused Q/K/V projection: one MXU matmul (bt*T, D) @ (D, 2*Dkp + Dvp).
    # 1/sqrt(Dk) is already folded into the Q columns of w (wrapper).
    x2 = x_ref[...].reshape(bt * T, D)
    qkv = jnp.dot(x2, w_ref[...], preferred_element_type=jnp.float32)
    qkv = qkv.reshape(bt, T, E)

    q = qkv[:, :, :dkp]
    k = qkv[:, :, dkp:2 * dkp]
    v = qkv[:, :, 2 * dkp:]

    # scores = (Q K^T) / sqrt(dk)   (scale already folded into q)
    scores = jnp.einsum("btd,bsd->bts", q, k, preferred_element_type=jnp.float32)
    # Precomputed additive causal mask (already scaled by 1/sqrt(dk)), VMEM-resident.
    scores = scores + mask_ref[...][None, :, :]

    # Softmax over the key axis (axis=2 in PyTorch == last axis here).
    m = jnp.max(scores, axis=-1, keepdims=True)
    e = jnp.exp(scores - m)
    denom = jnp.sum(e, axis=-1, keepdims=True)
    s = e * pl.reciprocal(denom, approx=False)  # exact: keep 1e-5 parity with the module

    out = jnp.einsum("bts,bsv->btv", s, v, preferred_element_type=jnp.float32)
    o_ref[...] = out.astype(o_ref.dtype)


def _hw_info():
    """Best-effort TPU generation / VMEM query with safe, conservative fallbacks."""
    vmem_phys = 64 * 1024 * 1024          # conservative default (v7x per-TC VMEM)
    two_tc = False
    try:
        kind = jax.devices()[0].device_kind.lower()
    except Exception:
        kind = ""
    if "v7" in kind:
        two_tc = True
        vmem_phys = 64 * 1024 * 1024
    elif ("v5" in kind) or ("v6" in kind):
        vmem_phys = 128 * 1024 * 1024
    try:
        vmem_phys = min(vmem_phys, int(pltpu.get_tpu_info().vmem_capacity_bytes))
    except Exception:
        pass
    return vmem_phys, two_tc


def single_head_attention(x, wq, wk, wv, *, batch_block=None):
    """
    x  : (B, T, D) float32
    wq, wk : (Dk, D)  -- PyTorch nn.Linear weight layout (out_features, in_features)
    wv     : (Dv, D)
    Returns (B, T, Dv) float32.
    """
    B, T, D = x.shape
    Dk = wq.shape[0]
    Dv = wv.shape[0]
    assert wq.shape[1] == D and wk.shape == wq.shape and wv.shape[1] == D

    # Pad key/query/value widths to full 128-lane tiles (exact: zero columns).
    Dkp = _round_up(Dk, 128)
    Dvp = _round_up(Dv, 128)
    E = 2 * Dkp + Dvp

    vmem_phys, two_tc = _hw_info()
    vmem_limit = int(min(vmem_phys * 3 // 4, 96 * 1024 * 1024))  # 48 MiB v7x, 96 MiB v5e/v6e

    # --- pick per-step batch block bt ---
    # Conservative live f32 bytes per batch row per grid step:
    #   2x pipelined x block + 2x pipelined out block + fused qkv + q/k/v slices
    #   + scores + exp + output temporary.
    per_row_bytes = 4 * (2 * T * D + 2 * T * E + 3 * T * T + 3 * T * Dvp)
    # Resident (single-buffered) operands: fused weight + causal mask, plus slack.
    fixed_bytes = 4 * (D * E + T * T) + (2 << 20)
    budget = max(int(vmem_phys * 0.6) - fixed_bytes, per_row_bytes)
    bt_cap = max(1, budget // per_row_bytes)

    # Target bt*T >= 256 rows into the fused projection matmul (fills a 256-wide MXU).
    target_bt = batch_block if batch_block is not None else max(8, -(-256 // T))
    bt = max(1, min(target_bt, bt_cap, B))
    if two_tc and B > 1:
        bt = min(bt, -(-B // 2))  # keep >= 2 grid steps only on 2-TC chips (v7x)
    bt = max(1, bt)

    # Pad batch so the grid divides evenly (padded rows are zeros; sliced off below).
    Bp = -(-B // bt) * bt
    xp = jnp.pad(x, ((0, Bp - B), (0, 0), (0, 0))) if Bp != B else x

    # Fused, zero-padded projection weight: cols [0:Dk] -> Q (pre-scaled), [Dkp:Dkp+Dk] -> K,
    # [2*Dkp:2*Dkp+Dv] -> V.  Folding 1/sqrt(Dk) into the Q columns is exact w.r.t. the
    # module's (Q K^T + mask) / sqrt(Dk): the mask below is scaled identically.
    scale = 1.0 / math.sqrt(Dk)
    w = jnp.zeros((D, E), dtype=jnp.float32)
    w = w.at[:, :Dk].set(wq.T.astype(jnp.float32) * jnp.float32(scale))
    w = w.at[:, Dkp:Dkp + Dk].set(wk.T.astype(jnp.float32))
    w = w.at[:, 2 * Dkp:2 * Dkp + Dv].set(wv.T.astype(jnp.float32))

    # Additive causal mask (module masks the diagonal too: triu(ones, diagonal=0)),
    # pre-scaled by 1/sqrt(Dk).  Large finite negative keeps fully-masked rows NaN-free.
    mask = jnp.triu(jnp.ones((T, T), dtype=jnp.float32), k=0) * jnp.float32(-1e10 * scale)

    kernel = partial(_attention_kernel, dkp=Dkp, dvp=Dvp)

    def _call(single_buffer_consts):
        const_kw = {"pipeline_mode": pl.Buffered(1)} if single_buffer_consts else {}
        return pl.pallas_call(
            kernel,
            out_shape=jax.ShapeDtypeStruct((Bp, T, Dvp), jnp.float32),
            grid_spec=pltpu.PrefetchScalarGridSpec(
                num_scalar_prefetch=0,
                grid=(Bp // bt,),
                in_specs=[
                    pl.BlockSpec((bt, T, D), lambda b: (b, 0, 0)),        # x: bt batch rows
                    pl.BlockSpec((D, E), lambda b: (0, 0), **const_kw),   # fused QKV weight
                    pl.BlockSpec((T, T), lambda b: (0, 0), **const_kw),   # scaled causal mask
                ],
                out_specs=pl.BlockSpec((bt, T, Dvp), lambda b: (b, 0, 0)),
            ),
            compiler_params=pltpu.CompilerParams(
                dimension_semantics=("parallel",),
                vmem_limit_bytes=vmem_limit,
            ),
        )(xp, w, mask)

    try:
        # Constant-index operands single-buffered: DMA'd once, no wasted double buffer.
        out = _call(True)
    except Exception:
        # Fallback if this Pallas build rejects pipeline_mode=pl.Buffered(1).
        out = _call(False)

    return out[:B, :, :Dv]


def _reference(x, wq, wk, wv):
    """Pure-JAX reference matching the PyTorch forward exactly."""
    K = x @ wk.T
    Q = x @ wq.T
    V = x @ wv.T
    T = K.shape[1]
    c = jnp.triu(jnp.ones((T, T), dtype=x.dtype), k=0) * -10000000000.0
    D = jnp.einsum("btd,bsd->bts", Q, K)
    M = D + c
    S = jax.nn.softmax(M / math.sqrt(K.shape[2]), axis=2)
    return jnp.einsum("bts,bsv->btv", S, V)


if __name__ == "__main__":
    key = jax.random.PRNGKey(0)

    def make_case(case_key, B, T, Din, Dk, Dv):
        kx, kq, kk, kv = jax.random.split(case_key, 4)
        xx = jax.random.normal(kx, (B, T, Din), dtype=jnp.float32)
        bound = 1.0 / math.sqrt(Din)  # nn.Linear default init, weight shape (out, in)
        q = jax.random.uniform(kq, (Dk, Din), minval=-bound, maxval=bound, dtype=jnp.float32)
        k = jax.random.uniform(kk, (Dk, Din), minval=-bound, maxval=bound, dtype=jnp.float32)
        v = jax.random.uniform(kv, (Dv, Din), minval=-bound, maxval=bound, dtype=jnp.float32)
        return xx, q, k, v

    k1, k2 = jax.random.split(key)

    # Case 1: module-consistent small shapes (batch=2, num_tokens=8, token_dim=32).
    x, wq, wk, wv = make_case(k1, B=2, T=8, Din=32, Dk=32, Dv=32)
    out = jax.block_until_ready(single_head_attention(x, wq, wk, wv))
    ref = _reference(x, wq, wk, wv)
    assert out.shape == ref.shape, (out.shape, ref.shape)
    assert jnp.allclose(out, ref, atol=1e-5, rtol=1e-5), float(jnp.max(jnp.abs(out - ref)))

    # Case 2: uneven batch (exercises batch padding) and non-default Dk/Dv (lane padding).
    x, wq, wk, wv = make_case(k2, B=5, T=16, Din=32, Dk=24, Dv=40)
    out = jax.block_until_ready(single_head_attention(x, wq, wk, wv))
    ref = _reference(x, wq, wk, wv)
    assert out.shape == ref.shape, (out.shape, ref.shape)
    assert jnp.allclose(out, ref, atol=1e-5, rtol=1e-5), float(jnp.max(jnp.abs(out - ref)))

    print("KERNEL_OK")
</pallas_src>

<mosaic_0001>
module attributes {stable_mosaic.version = 11 : i64} {
  func.func @_attention_kernel(%arg0: i32, %arg1: memref<2x8x32xf32, #tpu.memory_space<vmem>>, %arg2: memref<32x384xf32, #tpu.memory_space<vmem>>, %arg3: memref<8x8xf32, #tpu.memory_space<vmem>>, %arg4: memref<2x8x128xf32, #tpu.memory_space<vmem>>) attributes {dimension_semantics = [#tpu.dimension_semantics<parallel>], iteration_bounds = array<i64: 1>, scalar_prefetch = 0 : i64, scratch_operands = 0 : i64, tpu.core_type = #tpu.core_type<tc>, window_params = [{transform_indices = @transform_0, window_bounds = array<i64: 2, 8, 32>}, {pipeline_mode = #tpu.pipeline_mode<synchronous>, transform_indices = @transform_1, window_bounds = array<i64: 32, 384>}, {pipeline_mode = #tpu.pipeline_mode<synchronous>, transform_indices = @transform_2, window_bounds = array<i64: 8, 8>}, {transform_indices = @transform_3, window_bounds = array<i64: 2, 8, 128>}]} {
    %c0 = arith.constant 0 : index
    %c0_0 = arith.constant 0 : index
    %c0_1 = arith.constant 0 : index
    %0 = vector.load %arg1[%c0, %c0_0, %c0_1] : memref<2x8x32xf32, #tpu.memory_space<vmem>>, vector<2x8x32xf32>
    %1 = vector.shape_cast %0 : vector<2x8x32xf32> to vector<16x32xf32>
    %c0_2 = arith.constant 0 : index
    %c0_3 = arith.constant 0 : index
    %2 = vector.load %arg2[%c0_2, %c0_3] : memref<32x384xf32, #tpu.memory_space<vmem>>, vector<32x384xf32>
    %cst = arith.constant dense<0.000000e+00> : vector<16x384xf32>
    %3 = tpu.matmul %1, %2, %cst {dimension_numbers = #tpu.dot_dimension_numbers<[1], [0], [0], [1], [0, 0, 1, 1], [], []>} : vector<16x32xf32>, vector<32x384xf32>, vector<16x384xf32> -> vector<16x384xf32>
    %4 = vector.shape_cast %3 : vector<16x384xf32> to vector<2x8x384xf32>
    %5 = vector.extract_strided_slice %4 {offsets = [0, 0, 0], sizes = [2, 8, 128], strides = [1, 1, 1]} : vector<2x8x384xf32> to vector<2x8x128xf32>
    %6 = vector.extract_strided_slice %4 {offsets = [0, 0, 128], sizes = [2, 8, 128], strides = [1, 1, 1]} : vector<2x8x384xf32> to vector<2x8x128xf32>
    %7 = vector.extract_strided_slice %4 {offsets = [0, 0, 256], sizes = [2, 8, 128], strides = [1, 1, 1]} : vector<2x8x384xf32> to vector<2x8x128xf32>
    "tpu.trace_start"() <{level = 10 : i32, message = "btd,bsd->bts"}> : () -> ()
    %cst_4 = arith.constant dense<0.000000e+00> : vector<2x8x8xf32>
    %8 = tpu.matmul %5, %6, %cst_4 {dimension_numbers = #tpu.dot_dimension_numbers<[2], [2], [1], [1], [0, 0, 0, 1, 1, 1], [0], [0]>} : vector<2x8x128xf32>, vector<2x8x128xf32>, vector<2x8x8xf32> -> vector<2x8x8xf32>
    "tpu.trace_stop"() : () -> ()
    %c0_5 = arith.constant 0 : index
    %c0_6 = arith.constant 0 : index
    %9 = vector.load %arg3[%c0_5, %c0_6] : memref<8x8xf32, #tpu.memory_space<vmem>>, vector<8x8xf32>
    %10 = vector.shape_cast %9 : vector<8x8xf32> to vector<1x8x8xf32>
    %11 = vector.broadcast %10 : vector<1x8x8xf32> to vector<2x8x8xf32>
    %12 = arith.addf %8, %11 : vector<2x8x8xf32>
    %cst_7 = arith.constant dense<0xFF800000> : vector<2x8xf32>
    %13 = vector.multi_reduction <maximumf>, %12, %cst_7 [2] : vector<2x8x8xf32> to vector<2x8xf32>
    %14 = vector.shape_cast %13 : vector<2x8xf32> to vector<2x8x1xf32>
    %15 = vector.broadcast %14 : vector<2x8x1xf32> to vector<2x8x8xf32>
    %16 = arith.subf %12, %15 : vector<2x8x8xf32>
    %17 = math.exp %16 : vector<2x8x8xf32>
    %cst_8 = arith.constant dense<0.000000e+00> : vector<2x8xf32>
    %18 = vector.multi_reduction <add>, %17, %cst_8 [2] : vector<2x8x8xf32> to vector<2x8xf32>
    %19 = vector.shape_cast %18 : vector<2x8xf32> to vector<2x8x1xf32>
    %20 = tpu.reciprocal %19 : vector<2x8x1xf32> -> vector<2x8x1xf32>
    %21 = vector.broadcast %20 : vector<2x8x1xf32> to vector<2x8x8xf32>
    %22 = arith.mulf %17, %21 : vector<2x8x8xf32>
    "tpu.trace_start"() <{level = 10 : i32, message = "bts,bsv->btv"}> : () -> ()
    %cst_9 = arith.constant dense<0.000000e+00> : vector<2x8x128xf32>
    %23 = tpu.matmul %22, %7, %cst_9 {dimension_numbers = #tpu.dot_dimension_numbers<[2], [1], [1], [2], [0, 0, 0, 1, 1, 2], [0], [0]>} : vector<2x8x8xf32>, vector<2x8x128xf32>, vector<2x8x128xf32> -> vector<2x8x128xf32>
    "tpu.trace_stop"() : () -> ()
    %c0_10 = arith.constant 0 : index
    %c0_11 = arith.constant 0 : index
    %c0_12 = arith.constant 0 : index
    %24 = vector.load %arg4[%c0_10, %c0_11, %c0_12] : memref<2x8x128xf32, #tpu.memory_space<vmem>>, vector<2x8x128xf32>
    tpu.vector_store %arg4[%c0_10, %c0_11, %c0_12], %23 {strides = array<i32>} : memref<2x8x128xf32, #tpu.memory_space<vmem>>, vector<2x8x128xf32>,
    return
  }
  func.func @transform_0(%arg0: i32) -> (i32, i32, i32) {
    %c0_i32 = arith.constant 0 : i32
    %c0_i32_0 = arith.constant 0 : i32
    %c0_i32_1 = arith.constant 0 : i32
    return %arg0, %c0_i32, %c0_i32_0 : i32, i32, i32
  }
  func.func @transform_1(%arg0: i32) -> (i32, i32) {
    %c0_i32 = arith.constant 0 : i32
    %c0_i32_0 = arith.constant 0 : i32
    %c0_i32_1 = arith.constant 0 : i32
    return %c0_i32, %c0_i32_0 : i32, i32
  }
  func.func @transform_2(%arg0: i32) -> (i32, i32) {
    %c0_i32 = arith.constant 0 : i32
    %c0_i32_0 = arith.constant 0 : i32
    %c0_i32_1 = arith.constant 0 : i32
    return %c0_i32, %c0_i32_0 : i32, i32
  }
  func.func @transform_3(%arg0: i32) -> (i32, i32, i32) {
    %c0_i32 = arith.constant 0 : i32
    %c0_i32_0 = arith.constant 0 : i32
    %c0_i32_1 = arith.constant 0 : i32
    return %arg0, %c0_i32, %c0_i32_0 : i32, i32, i32
  }
}

module attributes {stable_mosaic.version = 11 : i64} {
  func.func @_attention_kernel(%arg0: i32, %arg1: memref<2x8x32xf32, #tpu.memory_space<vmem>>, %arg2: memref<32x384xf32, #tpu.memory_space<vmem>>, %arg3: memref<8x8xf32, #tpu.memory_space<vmem>>, %arg4: memref<2x8x128xf32, #tpu.memory_space<vmem>>) attributes {dimension_semantics = [#tpu.dimension_semantics<parallel>], iteration_bounds = array<i64: 1>, scalar_prefetch = 0 : i64, scratch_operands = 0 : i64, tpu.core_type = #tpu.core_type<tc>, window_params = [{transform_indices = @transform_0, window_bounds = array<i64: 2, 8, 32>}, {pipeline_mode = #tpu.pipeline_mode<synchronous>, transform_indices = @transform_1, window_bounds = array<i64: 32, 384>}, {pipeline_mode = #tpu.pipeline_mode<synchronous>, transform_indices = @transform_2, window_bounds = array<i64: 8, 8>}, {transform_indices = @transform_3, window_bounds = array<i64: 2, 8, 128>}]} {
    %c0 = arith.constant 0 : index
    %c0_0 = arith.constant 0 : index
    %c0_1 = arith.constant 0 : index
    %0 = vector.load %arg1[%c0, %c0_0, %c0_1] : memref<2x8x32xf32, #tpu.memory_space<vmem>>, vector<2x8x32xf32>
    %1 = vector.shape_cast %0 : vector<2x8x32xf32> to vector<16x32xf32>
    %c0_2 = arith.constant 0 : index
    %c0_3 = arith.constant 0 : index
    %2 = vector.load %arg2[%c0_2, %c0_3] : memref<32x384xf32, #tpu.memory_space<vmem>>, vector<32x384xf32>
    %cst = arith.constant dense<0.000000e+00> : vector<16x384xf32>
    %3 = tpu.matmul %1, %2, %cst {dimension_numbers = #tpu.dot_dimension_numbers<[1], [0], [0], [1], [0, 0, 1, 1], [], []>} : vector<16x32xf32>, vector<32x384xf32>, vector<16x384xf32> -> vector<16x384xf32>
    %4 = vector.shape_cast %3 : vector<16x384xf32> to vector<2x8x384xf32>
    %5 = vector.extract_strided_slice %4 {offsets = [0, 0, 0], sizes = [2, 8, 128], strides = [1, 1, 1]} : vector<2x8x384xf32> to vector<2x8x128xf32>
    %6 = vector.extract_strided_slice %4 {offsets = [0, 0, 128], sizes = [2, 8, 128], strides = [1, 1, 1]} : vector<2x8x384xf32> to vector<2x8x128xf32>
    %7 = vector.extract_strided_slice %4 {offsets = [0, 0, 256], sizes = [2, 8, 128], strides = [1, 1, 1]} : vector<2x8x384xf32> to vector<2x8x128xf32>
    "tpu.trace_start"() <{level = 10 : i32, message = "btd,bsd->bts"}> : () -> ()
    %cst_4 = arith.constant dense<0.000000e+00> : vector<2x8x8xf32>
    %8 = tpu.matmul %5, %6, %cst_4 {dimension_numbers = #tpu.dot_dimension_numbers<[2], [2], [1], [1], [0, 0, 0, 1, 1, 1], [0], [0]>} : vector<2x8x128xf32>, vector<2x8x128xf32>, vector<2x8x8xf32> -> vector<2x8x8xf32>
    "tpu.trace_stop"() : () -> ()
    %c0_5 = arith.constant 0 : index
    %c0_6 = arith.constant 0 : index
    %9 = vector.load %arg3[%c0_5, %c0_6] : memref<8x8xf32, #tpu.memory_space<vmem>>, vector<8x8xf32>
    %10 = vector.shape_cast %9 : vector<8x8xf32> to vector<1x8x8xf32>
    %11 = vector.broadcast %10 : vector<1x8x8xf32> to vector<2x8x8xf32>
    %12 = arith.addf %8, %11 : vector<2x8x8xf32>
    %cst_7 = arith.constant dense<0xFF800000> : vector<2x8xf32>
    %13 = vector.multi_reduction <maximumf>, %12, %cst_7 [2] : vector<2x8x8xf32> to vector<2x8xf32>
    %14 = vector.shape_cast %13 : vector<2x8xf32> to vector<2x8x1xf32>
    %15 = vector.broadcast %14 : vector<2x8x1xf32> to vector<2x8x8xf32>
    %16 = arith.subf %12, %15 : vector<2x8x8xf32>
    %17 = math.exp %16 : vector<2x8x8xf32>
    %cst_8 = arith.constant dense<0.000000e+00> : vector<2x8xf32>
    %18 = vector.multi_reduction <add>, %17, %cst_8 [2] : vector<2x8x8xf32> to vector<2x8xf32>
    %19 = vector.shape_cast %18 : vector<2x8xf32> to vector<2x8x1xf32>
    %20 = tpu.reciprocal %19 : vector<2x8x1xf32> -> vector<2x8x1xf32>
    %21 = vector.broadcast %20 : vector<2x8x1xf32> to vector<2x8x8xf32>
    %22 = arith.mulf %17, %21 : vector<2x8x8xf32>
    "tpu.trace_start"() <{level = 10 : i32, message = "bts,bsv->btv"}> : () -> ()
    %cst_9 = arith.constant dense<0.000000e+00> : vector<2x8x128xf32>
    %23 = tpu.matmul %22, %7, %cst_9 {dimension_numbers = #tpu.dot_dimension_numbers<[2], [1], [1], [2], [0, 0, 0, 1, 1, 2], [0], [0]>} : vector<2x8x8xf32>, vector<2x8x128xf32>, vector<2x8x128xf32> -> vector<2x8x128xf32>
    "tpu.trace_stop"() : () -> ()
    %c0_10 = arith.constant 0 : index
    %c0_11 = arith.constant 0 : index
    %c0_12 = arith.constant 0 : index
    %24 = vector.load %arg4[%c0_10, %c0_11, %c0_12] : memref<2x8x128xf32, #tpu.memory_space<vmem>>, vector<2x8x128xf32>
    tpu.vector_store %arg4[%c0_10, %c0_11, %c0_12], %23 {strides = array<i32>} : memref<2x8x128xf32, #tpu.memory_space<vmem>>, vector<2x8x128xf32>,
    return
  }
  func.func @transform_0(%arg0: i32) -> (i32, i32, i32) {
    %c0_i32 = arith.constant 0 : i32
    %c0_i32_0 = arith.constant 0 : i32
    %c0_i32_1 = arith.constant 0 : i32
    return %arg0, %c0_i32, %c0_i32_0 : i32, i32, i32
  }
  func.func @transform_1(%arg0: i32) -> (i32, i32) {
    %c0_i32 = arith.constant 0 : i32
    %c0_i32_0 = arith.constant 0 : i32
    %c0_i32_1 = arith.constant 0 : i32
    return %c0_i32, %c0_i32_0 : i32, i32
  }
  func.func @transform_2(%arg0: i32) -> (i32, i32) {
    %c0_i32 = arith.constant 0 : i32
    %c0_i32_0 = arith.constant 0 : i32
    %c0_i32_1 = arith.constant 0 : i32
    return %c0_i32, %c0_i32_0 : i32, i32
  }
  func.func @transform_3(%arg0: i32) -> (i32, i32, i32) {
    %c0_i32 = arith.constant 0 : i32
    %c0_i32_0 = arith.constant 0 : i32
    %c0_i32_1 = arith.constant 0 : i32
    return %arg0, %c0_i32, %c0_i32_0 : i32, i32, i32
  }
}

</mosaic_0001>

<bundles_post_ra>
// kernel: tpu_custom_call.1
= control target key start
LH: loop header
LB: loop body
LE: loop exit
PB: predicated region body
PF: predicated region fallthrough
CT: control target
= control target key end

     0   :  { %8 = vsyncpa [#allocation3], 0  ;;  %s834_s0 = inlined_call_operand.hbm [shape: f32[2,8,32], index: 0, kind: input, shape index: {}]   ;;  %s835_s1 = inlined_call_operand.hbm [shape: f32[32,384], index: 1, kind: input, shape index: {}]   ;;  %s836_s2 = inlined_call_operand.hbm [shape: f32[8,8], index: 2, kind: input, shape index: {}]   ;;  %s837_s3 = inlined_call_operand.hbm [shape: f32[2,8,128], index: 3, kind: output, shape index: {}]  }
   0x1   :  { %9 = vsyncpa [#allocation6], 0 }
   0x2   :  { %10 = vsyncpa [#allocation4], 0  ;;  %s736_s12 = smov [#allocation5]   ;;  %s642_s16 = scalar_lea.hbm %s835_s1, 1536 }
   0x3   :  { %s28_s13 = sshll.u32 %s736_s12, 4  ;;  %p643_p0 = scmp.ne.s32.totalorder %s835_s1, %s642_s16  ;;  %s29_s13 = int_to_ptr.vmem [resolvable:$true] %s28_s13 }
   0x4   :  { %p646_p1 = scmp.lt.u32.totalorder %s642_s16, %s835_s1 }
   0x6   :  { %p648_p2 = pnand %p646_p1, %p643_p0 }
   0x8   :  { %651 = shalt.err (!%p648_p2)
}
   0x9   :  { %s652_s21 = scalar_lea.vmem %s29_s13, 1536  ;;  %p657_p4 = scmp.lt.s32.totalorder %s29_s13, %s29_s13 }
   0xa   :  { %p653_p3 = scmp.ne.s32.totalorder %s29_s13, %s652_s21  ;;  %p658_p5 = scmp.lt.s32.totalorder %s652_s21, %s652_s21 }
   0xc   :  { %p659_p6 = por %p658_p5, %p657_p4 }
   0xe   :  { %p660_p7 = pnand %p659_p6, %p653_p3 }
  0x10   :  { %663 = shalt.err (!%p660_p7)
}
  0x11   :  { %s737_s22 = smov 384   ;;  %s738_s23 = smov 24  }
  0x12   :  { %34 = dma.hbm_to_vmem [thread:$0]  %s835_s1, 1536, %s29_s13, [#allocation6], %s737_s22, %s737_s22, %s738_s23  }
  0x13   :  { %s739_s26 = smov [#allocation2]   ;;  %s664_s30 = scalar_lea.hbm %s834_s0, 256 }
  0x14   :  { %s16_s27 = sshll.u32 %s739_s26, 4  ;;  %p665_p8 = scmp.ne.s32.totalorder %s834_s0, %s664_s30  ;;  %s17_s27 = int_to_ptr.vmem [resolvable:$true] %s16_s27 }
  0x15   :  { %p668_p9 = scmp.lt.u32.totalorder %s664_s30, %s834_s0 }
  0x17   :  { %p670_p10 = pnand %p668_p9, %p665_p8 }
  0x19   :  { %673 = shalt.err (!%p670_p10)
}
  0x1a   :  { %s674_s8 = scalar_lea.vmem %s17_s27, 256  ;;  %p679_p12 = scmp.lt.s32.totalorder %s17_s27, %s17_s27 }
  0x1b   :  { %p675_p11 = scmp.ne.s32.totalorder %s17_s27, %s674_s8  ;;  %p680_p13 = scmp.lt.s32.totalorder %s674_s8, %s674_s8 }
  0x1d   :  { %p681_p0 = por %p680_p13, %p679_p12 }
  0x1f   :  { %p682_p1 = pnand %p681_p0, %p675_p11 }
  0x21   :  { %685 = shalt.err (!%p682_p1)
}
  0x22   :  { %s740_s1 = smov 128   ;;  %s741_s9 = smov 8  }
  0x23   :  { %22 = dma.hbm_to_vmem [thread:$0]  %s834_s0, 256, %s17_s27, [#allocation3], %s740_s1, %s740_s1, %s741_s9  }
  0x24   :  { %s742_s12 = smov [#allocation7]   ;;  %s686_s16 = scalar_lea.hbm %s836_s2, 128 }
  0x25   :  { %s41_s13 = sshll.u32 %s742_s12, 4  ;;  %p687_p2 = scmp.ne.s32.totalorder %s836_s2, %s686_s16  ;;  %s42_s13 = int_to_ptr.vmem [resolvable:$true] %s41_s13 }
  0x26   :  { %p690_p3 = scmp.lt.u32.totalorder %s686_s16, %s836_s2 }
  0x28   :  { %p692_p4 = pnand %p690_p3, %p687_p2 }
  0x2a   :  { %695 = shalt.err (!%p692_p4)
}
  0x2b   :  { %s696_s21 = scalar_lea.vmem %s42_s13, 128  ;;  %p701_p6 = scmp.lt.s32.totalorder %s42_s13, %s42_s13 }
  0x2c   :  { %p697_p5 = scmp.ne.s32.totalorder %s42_s13, %s696_s21  ;;  %p702_p7 = scmp.lt.s32.totalorder %s696_s21, %s696_s21 }
  0x2e   :  { %p703_p8 = por %p702_p7, %p701_p6 }
  0x30   :  { %p704_p9 = pnand %p703_p8, %p697_p5 }
  0x32   :  { %707 = shalt.err (!%p704_p9)
}
  0x33   :  { %44 = dma.hbm_to_vmem [thread:$0]  %s836_s2, 128, %s42_s13, [#allocation6]  }
  0x34   :  { %730 = dma.done.wait [#allocation3], 256  }
  0x35   :  { %731 = vsyncadd [#allocation3], 4294967040 }
  0x36   :  { %732 = dma.done.wait [#allocation6], 1664  }
  0x37   :  { %733 = vsyncadd [#allocation6], 4294965632  ;;  %v743_v0 = vmov 0.0   ;;  %v57_v1 = vld [vmem:[#allocation5 + $0x8] sm:$0xff]  ;;  %v60_v2 = vld [vmem:[#allocation5 + $0x20] sm:$0xff]  ;;  %vm68_vm0 = vcmask 261120  }
  0x38   :  { %139 = vmatprep.mubr.f32.mxu0 %v743_v0  ;;  %v56_v3 = vld [vmem:[#allocation5] sm:$0xff]  ;;  %v608_v4 = vpack.c.bf16 %v60_v2, %v57_v1  ;;  %v59_v5 = vld [vmem:[#allocation5 + $0x18] sm:$0xff]  ;;  %v66_v7 = vld [vmem:[#allocation5 + $0x50] sm:$0xff]  ;;  %vm744_vm1 = vmmov 0   ;;  %vm368_vm2 = vcmask 64512   ;;  %s745_s2 = smov [#allocation8]  }
  0x39   :  { %v63_v6 = vld [vmem:[#allocation5 + $0x38] sm:$0xff]  ;;  %v610_v8 = vpack.c.bf16 %v59_v5, %v56_v3  ;;  %v62_v10 = vld [vmem:[#allocation5 + $0x30] sm:$0xff]  ;;  %v65_v11 = vld [vmem:[#allocation5 + $0x48] sm:$0xff]  ;;  %s544_s23 = sshll.u32 %s745_s2, 4  ;;  %s545_s23 = int_to_ptr.vmem [resolvable:$true] %s544_s23 }
  0x3a   :  { %v612_v9 = vpack.c.bf16 %v66_v7, %v63_v6  ;;  %v54_v12 = vld [vmem:[#allocation2] sm:$0xff]  ;;  %609 = vmatprep.subr.bf16.mxu0 %v608_v4  ;;  %v61_v14 = vld [vmem:[#allocation5 + $0x28] sm:$0xff]  ;;  %v614_v15 = vpack.c.bf16 %v65_v11, %v62_v10  ;;  %v64_v17 = vld [vmem:[#allocation5 + $0x40] sm:$0xff]  ;;  %s708_s24 = scalar_lea.vmem %s545_s23, 256  ;;  %p713_p11 = scmp.lt.s32.totalorder %s545_s23, %s545_s23 }
  0x3b   :  { %v58_v13 = vld [vmem:[#allocation5 + $0x10] sm:$0xff]  ;;  %585 = vmatprep.mubr.msk.f32.mxu1 %vm68_vm0, %v54_v12  ;;  %611 = vmatpush1.bf16.msra.mxu0 %v610_v8  ;;  %v67_v18 = vld [vmem:[#allocation5 + $0x58] sm:$0xff]  ;;  %v227_v27 = vld [vmem:[#allocation7] sm:$0xff]  ;;  %p709_p10 = scmp.ne.s32.totalorder %s545_s23, %s708_s24  ;;  %p714_p12 = scmp.lt.s32.totalorder %s708_s24, %s708_s24 }
  0x3c   :  { %v616_v16 = vpack.c.bf16 %v61_v14, %v58_v13  ;;  %613 = vmatprep.subr.bf16.mxu0 %v612_v9  ;;  %v620_v19 = vpack.c.bf16 %v67_v18, %v64_v17  ;;  %v55_v20 = vld [vmem:[#allocation2 + $0x8] sm:$0xff] }
  0x3d   :  { %p715_p13 = por %p714_p12, %p713_p11 }
  0x3e   :  { %617 = vmatprep.subr.bf16.mxu1 %v616_v16 }
  0x3f   :  { %619 = vmatpush3.bf16.msra.mxu1 %v616_v16  ;;  %615 = vmatpush1.bf16.msra.mxu0 %v614_v15  ;;  %p716_p0 = pnand %p715_p13, %p709_p10 }
  0x40   :  { %621 = vmatprep.subr.bf16.mxu1 %v620_v19  ;;  %593 = vmatprep.subr.mxu0 %v743_v0 }
  0x42   :  { %557 = vmatmul.mubr.msk.f32.vlgmr.msra.gmra.mrb[0].mxu0 %vm68_vm0, %v54_v12 }
  0x43   :  { %623 = vmatpush3.bf16.msra.mxu1 %v620_v19  ;;  %145 = vmatprep.mubr.f32.mxu0 %v743_v0 }
  0x44   :  { %588 = vmatprep.subr.mxu1 %v743_v0 }
  0x46   :  { %586 = vmatmul.mubr.msk.f32.vlgmr.msra.gmra.mrb[0].mxu1 %vm68_vm0, %v55_v20  ;;  %558 = vmatmul.mubr.msk.f32.gmra.mrb[2].mxu0 %vm68_vm0, %v55_v20 }
  0x47   :  { %590 = vmatprep.mubr.msk.f32.mxu1 %vm744_vm1, %v743_v0  ;;  %595 = vmatprep.mubr.msk.f32.mxu0 %vm744_vm1, %v743_v0 }
 0x115   :  { %v141_v21 = vpop.f32.mrb[0].mxu0 }
 0x116   :  { %v143_v22 = vpop.f32.mrb[1].mxu0 }
 0x117   :  { %589 = vmatpush3.xpose.msra.mxu1 %v143_v22 }
 0x118   :  { %598 = vmatprep.subr.mxu1 %v743_v0 }
 0x119   :  { %v587_v23 = vpop.f32.mrb[0].mxu1  ;;  %v147_v24 = vpop.f32.mrb[2].mxu0 }
 0x11a   :  { %v218_v25 = vpop.f32.mrb[1].mxu1  ;;  %v149_v26 = vpop.f32.mrb[3].mxu0  ;;  %591 = vmatmul.mubr.f32.vlgmr.msra.gmra.mrb[2].mxu1 %v141_v21 }
 0x11b   :  { %594 = vmatpush3.xpose.msra.mxu0 %v149_v26  ;;  %599 = vmatpush3.msra.mxu1 %v218_v25 }
 0x11c   :  { %603 = vmatprep.subr.mxu0 %v743_v0  ;;  %600 = vmatprep.mubr.msk.f32.mxu1 %vm744_vm1, %v743_v0 }
 0x11e   :  { %596 = vmatmul.mubr.f32.vlgmr.msra.gmra.mrb[4].mxu0 %v147_v24 }
 0x11f   :  { %604 = vmatpush3.msra.mxu0 %v587_v23  ;;  %605 = vmatprep.mubr.msk.f32.mxu0 %vm744_vm1, %v743_v0 }
 0x1ed   :  { %v294_v28 = vpop.f32.mrb[2].mxu1 }
 0x1ee   :  { %v295_v29 = vadd.f32 %v294_v28, %v227_v27  ;;  %v592_v30 = vpop.f32.mrb[3].mxu1 }
 0x1f0   :  { %v369_v31 = vsel %vm368_vm2, %v295_v29, -inf }
 0x1f1   :  { %370 = vmax.xlane.f32.xlu0 %v369_v31  ;;  %v364_v32 = vpop.f32.mrb[4].mxu0 }
 0x1f2   :  { %v365_v33 = vadd.f32 %v364_v32, %v227_v27  ;;  %v597_v34 = vpop.f32.mrb[5].mxu0 }
 0x1f4   :  { %v372_v35 = vsel %vm368_vm2, %v365_v33, -inf }
 0x1f5   :  { %373 = vmax.xlane.f32.xlu0 %v372_v35 }
 0x27e   :  { %v371_v36 = vpop.xlane.xlu0 %370 }
 0x27f   :  { %v375_v37 = vsub.f32 %v295_v29, %v371_v36 }
 0x281   :  { %v377_v38 = vmul.f32 1.442695, %v375_v37 }
 0x282   :  { %v374_v39 = vpop.xlane.xlu0 %373 }
 0x283   :  { %634 = vpow2.f32 %v377_v38  ;;  %v376_v40 = vsub.f32 %v365_v33, %v374_v39 }
 0x285   :  { %v379_v41 = vmul.f32 1.442695, %v376_v40 }
 0x287   :  { %636 = vpow2.f32 %v379_v41 }
 0x28d   :  { %v635_v42 = vpop.eup %634 }
 0x28e   :  { %v381_v43 = vsel %vm368_vm2, %v635_v42, 0.0 }
 0x28f   :  { %382 = vadd.xlane.f32.xlu1 %v381_v43 }
 0x291   :  { %v637_v44 = vpop.eup %636 }
 0x292   :  { %v384_v45 = vsel %vm368_vm2, %v637_v44, 0.0 }
 0x293   :  { %385 = vadd.xlane.f32.xlu1 %v384_v45 }
 0x31c   :  { %v383_v46 = vpop.xlane.xlu1 %382 }
 0x31d   :  { %638 = vrcp.f32 %v383_v46 }
 0x320   :  { %v386_v47 = vpop.xlane.xlu1 %385 }
 0x321   :  { %640 = vrcp.f32 %v386_v47 }
 0x327   :  { %v639_v48 = vpop.eup %638 }
 0x328   :  { %v389_v49 = vmul.f32 %v639_v48, %v635_v42 }
 0x32a   :  { %601 = vmatmul.mubr.msk.f32.vlgmr.msra.gmra.mrb[4].mxu1 %vm368_vm2, %v389_v49 }
 0x32b   :  { %v641_v50 = vpop.eup %640 }
 0x32c   :  { %v390_v51 = vmul.f32 %v641_v50, %v637_v44 }
 0x32e   :  { %606 = vmatmul.mubr.msk.f32.vlgmr.msra.gmra.mrb[6].mxu0 %vm368_vm2, %v390_v51 }
 0x3fd   :  { %v460_v52 = vpop.f32.mrb[4].mxu1 }
 0x3fe   :  { %537 = vst [vmem:[#allocation8] sm:$0xff] %v460_v52  ;;  %v602_v53 = vpop.f32.mrb[5].mxu1 }
 0x401   :  { %v533_v54 = vpop.f32.mrb[6].mxu0 }
 0x402   :  { %538 = vst [vmem:[#allocation8 + $0x8] sm:$0xff] %v533_v54  ;;  %v607_v55 = vpop.f32.mrb[7].mxu0 }
 0x403   :  { %719 = shalt.err (!%p716_p0)
}
 0x404   :  { %s720_s27 = scalar_lea.hbm %s837_s3, 256 }
 0x405   :  { %p721_p1 = scmp.ne.s32.totalorder %s837_s3, %s720_s27  ;;  %p724_p2 = scmp.lt.u32.totalorder %s720_s27, %s837_s3 }
 0x407   :  { %p726_p3 = pnand %p724_p2, %p721_p1 }
 0x409   :  { %729 = shalt.err (!%p726_p3)
}
 0x40a   :  { %550 = dma.vmem_to_hbm [thread:$0]  %s545_s23, 256, %s837_s3, [#allocation4], %s740_s1, %s740_s1, %s741_s9  }
 0x40b   :  { %734 = dma.done.wait [#allocation4], 256  }
 0x40c   :  { %735 = vsyncadd [#allocation4], 4294967040 }
 0x40d   :  { %554 = vsyncpa [#allocation3], 1 }
 0x40e   :  { %555 = vsyncpa [#allocation6], 1 }
 0x40f   :  { %556 = vsyncpa [#allocation4], 1 }

// kernel: tpu_custom_call.1
= control target key start
LH: loop header
LB: loop body
LE: loop exit
PB: predicated region body
PF: predicated region fallthrough
CT: control target
= control target key end

     0   :  { %8 = vsyncpa [#allocation3], 0  ;;  %s834_s0 = inlined_call_operand.hbm [shape: f32[2,8,32], index: 0, kind: input, shape index: {}]   ;;  %s835_s1 = inlined_call_operand.hbm [shape: f32[32,384], index: 1, kind: input, shape index: {}]   ;;  %s836_s2 = inlined_call_operand.hbm [shape: f32[8,8], index: 2, kind: input, shape index: {}]   ;;  %s837_s3 = inlined_call_operand.hbm [shape: f32[2,8,128], index: 3, kind: output, shape index: {}]  }
   0x1   :  { %9 = vsyncpa [#allocation6], 0 }
   0x2   :  { %10 = vsyncpa [#allocation4], 0  ;;  %s736_s12 = smov [#allocation5]   ;;  %s642_s16 = scalar_lea.hbm %s835_s1, 1536 }
   0x3   :  { %s28_s13 = sshll.u32 %s736_s12, 4  ;;  %p643_p0 = scmp.ne.s32.totalorder %s835_s1, %s642_s16  ;;  %s29_s13 = int_to_ptr.vmem [resolvable:$true] %s28_s13 }
   0x4   :  { %p646_p1 = scmp.lt.u32.totalorder %s642_s16, %s835_s1 }
   0x6   :  { %p648_p2 = pnand %p646_p1, %p643_p0 }
   0x8   :  { %651 = shalt.err (!%p648_p2)
}
   0x9   :  { %s652_s21 = scalar_lea.vmem %s29_s13, 1536  ;;  %p657_p4 = scmp.lt.s32.totalorder %s29_s13, %s29_s13 }
   0xa   :  { %p653_p3 = scmp.ne.s32.totalorder %s29_s13, %s652_s21  ;;  %p658_p5 = scmp.lt.s32.totalorder %s652_s21, %s652_s21 }
   0xc   :  { %p659_p6 = por %p658_p5, %p657_p4 }
   0xe   :  { %p660_p7 = pnand %p659_p6, %p653_p3 }
  0x10   :  { %663 = shalt.err (!%p660_p7)
}
  0x11   :  { %s737_s22 = smov 384   ;;  %s738_s23 = smov 24  }
  0x12   :  { %34 = dma.hbm_to_vmem [thread:$0]  %s835_s1, 1536, %s29_s13, [#allocation6], %s737_s22, %s737_s22, %s738_s23  }
  0x13   :  { %s739_s26 = smov [#allocation2]   ;;  %s664_s30 = scalar_lea.hbm %s834_s0, 256 }
  0x14   :  { %s16_s27 = sshll.u32 %s739_s26, 4  ;;  %p665_p8 = scmp.ne.s32.totalorder %s834_s0, %s664_s30  ;;  %s17_s27 = int_to_ptr.vmem [resolvable:$true] %s16_s27 }
  0x15   :  { %p668_p9 = scmp.lt.u32.totalorder %s664_s30, %s834_s0 }
  0x17   :  { %p670_p10 = pnand %p668_p9, %p665_p8 }
  0x19   :  { %673 = shalt.err (!%p670_p10)
}
  0x1a   :  { %s674_s8 = scalar_lea.vmem %s17_s27, 256  ;;  %p679_p12 = scmp.lt.s32.totalorder %s17_s27, %s17_s27 }
  0x1b   :  { %p675_p11 = scmp.ne.s32.totalorder %s17_s27, %s674_s8  ;;  %p680_p13 = scmp.lt.s32.totalorder %s674_s8, %s674_s8 }
  0x1d   :  { %p681_p0 = por %p680_p13, %p679_p12 }
  0x1f   :  { %p682_p1 = pnand %p681_p0, %p675_p11 }
  0x21   :  { %685 = shalt.err (!%p682_p1)
}
  0x22   :  { %s740_s1 = smov 128   ;;  %s741_s9 = smov 8  }
  0x23   :  { %22 = dma.hbm_to_vmem [thread:$0]  %s834_s0, 256, %s17_s27, [#allocation3], %s740_s1, %s740_s1, %s741_s9  }
  0x24   :  { %s742_s12 = smov [#allocation7]   ;;  %s686_s16 = scalar_lea.hbm %s836_s2, 128 }
  0x25   :  { %s41_s13 = sshll.u32 %s742_s12, 4  ;;  %p687_p2 = scmp.ne.s32.totalorder %s836_s2, %s686_s16  ;;  %s42_s13 = int_to_ptr.vmem [resolvable:$true] %s41_s13 }
  0x26   :  { %p690_p3 = scmp.lt.u32.totalorder %s686_s16, %s836_s2 }
  0x28   :  { %p692_p4 = pnand %p690_p3, %p687_p2 }
  0x2a   :  { %695 = shalt.err (!%p692_p4)
}
  0x2b   :  { %s696_s21 = scalar_lea.vmem %s42_s13, 128  ;;  %p701_p6 = scmp.lt.s32.totalorder %s42_s13, %s42_s13 }
  0x2c   :  { %p697_p5 = scmp.ne.s32.totalorder %s42_s13, %s696_s21  ;;  %p702_p7 = scmp.lt.s32.totalorder %s696_s21, %s696_s21 }
  0x2e   :  { %p703_p8 = por %p702_p7, %p701_p6 }
  0x30   :  { %p704_p9 = pnand %p703_p8, %p697_p5 }
  0x32   :  { %707 = shalt.err (!%p704_p9)
}
  0x33   :  { %44 = dma.hbm_to_vmem [thread:$0]  %s836_s2, 128, %s42_s13, [#allocation6]  }
  0x34   :  { %730 = dma.done.wait [#allocation3], 256  }
  0x35   :  { %731 = vsyncadd [#allocation3], 4294967040 }
  0x36   :  { %732 = dma.done.wait [#allocation6], 1664  }
  0x37   :  { %733 = vsyncadd [#allocation6], 4294965632  ;;  %v743_v0 = vmov 0.0   ;;  %v57_v1 = vld [vmem:[#allocation5 + $0x8] sm:$0xff]  ;;  %v60_v2 = vld [vmem:[#allocation5 + $0x20] sm:$0xff]  ;;  %vm68_vm0 = vcmask 261120  }
  0x38   :  { %139 = vmatprep.mubr.f32.mxu0 %v743_v0  ;;  %v56_v3 = vld [vmem:[#allocation5] sm:$0xff]  ;;  %v608_v4 = vpack.c.bf16 %v60_v2, %v57_v1  ;;  %v59_v5 = vld [vmem:[#allocation5 + $0x18] sm:$0xff]  ;;  %v66_v7 = vld [vmem:[#allocation5 + $0x50] sm:$0xff]  ;;  %vm744_vm1 = vmmov 0   ;;  %vm368_vm2 = vcmask 64512   ;;  %s745_s2 = smov [#allocation8]  }
  0x39   :  { %v63_v6 = vld [vmem:[#allocation5 + $0x38] sm:$0xff]  ;;  %v610_v8 = vpack.c.bf16 %v59_v5, %v56_v3  ;;  %v62_v10 = vld [vmem:[#allocation5 + $0x30] sm:$0xff]  ;;  %v65_v11 = vld [vmem:[#allocation5 + $0x48] sm:$0xff]  ;;  %s544_s23 = sshll.u32 %s745_s2, 4  ;;  %s545_s23 = int_to_ptr.vmem [resolvable:$true] %s544_s23 }
  0x3a   :  { %v612_v9 = vpack.c.bf16 %v66_v7, %v63_v6  ;;  %v54_v12 = vld [vmem:[#allocation2] sm:$0xff]  ;;  %609 = vmatprep.subr.bf16.mxu0 %v608_v4  ;;  %v61_v14 = vld [vmem:[#allocation5 + $0x28] sm:$0xff]  ;;  %v614_v15 = vpack.c.bf16 %v65_v11, %v62_v10  ;;  %v64_v17 = vld [vmem:[#allocation5 + $0x40] sm:$0xff]  ;;  %s708_s24 = scalar_lea.vmem %s545_s23, 256  ;;  %p713_p11 = scmp.lt.s32.totalorder %s545_s23, %s545_s23 }
  0x3b   :  { %v58_v13 = vld [vmem:[#allocation5 + $0x10] sm:$0xff]  ;;  %585 = vmatprep.mubr.msk.f32.mxu1 %vm68_vm0, %v54_v12  ;;  %611 = vmatpush1.bf16.msra.mxu0 %v610_v8  ;;  %v67_v18 = vld [vmem:[#allocation5 + $0x58] sm:$0xff]  ;;  %v227_v27 = vld [vmem:[#allocation7] sm:$0xff]  ;;  %p709_p10 = scmp.ne.s32.totalorder %s545_s23, %s708_s24  ;;  %p714_p12 = scmp.lt.s32.totalorder %s708_s24, %s708_s24 }
  0x3c   :  { %v616_v16 = vpack.c.bf16 %v61_v14, %v58_v13  ;;  %613 = vmatprep.subr.bf16.mxu0 %v612_v9  ;;  %v620_v19 = vpack.c.bf16 %v67_v18, %v64_v17  ;;  %v55_v20 = vld [vmem:[#allocation2 + $0x8] sm:$0xff] }
  0x3d   :  { %p715_p13 = por %p714_p12, %p713_p11 }
  0x3e   :  { %617 = vmatprep.subr.bf16.mxu1 %v616_v16 }
  0x3f   :  { %619 = vmatpush3.bf16.msra.mxu1 %v616_v16  ;;  %615 = vmatpush1.bf16.msra.mxu0 %v614_v15  ;;  %p716_p0 = pnand %p715_p13, %p709_p10 }
  0x40   :  { %621 = vmatprep.subr.bf16.mxu1 %v620_v19  ;;  %593 = vmatprep.subr.mxu0 %v743_v0 }
  0x42   :  { %557 = vmatmul.mubr.msk.f32.vlgmr.msra.gmra.mrb[0].mxu0 %vm68_vm0, %v54_v12 }
  0x43   :  { %623 = vmatpush3.bf16.msra.mxu1 %v620_v19  ;;  %145 = vmatprep.mubr.f32.mxu0 %v743_v0 }
  0x44   :  { %588 = vmatprep.subr.mxu1 %v743_v0 }
  0x46   :  { %586 = vmatmul.mubr.msk.f32.vlgmr.msra.gmra.mrb[0].mxu1 %vm68_vm0, %v55_v20  ;;  %558 = vmatmul.mubr.msk.f32.gmra.mrb[2].mxu0 %vm68_vm0, %v55_v20 }
  0x47   :  { %590 = vmatprep.mubr.msk.f32.mxu1 %vm744_vm1, %v743_v0  ;;  %595 = vmatprep.mubr.msk.f32.mxu0 %vm744_vm1, %v743_v0 }
 0x115   :  { %v141_v21 = vpop.f32.mrb[0].mxu0 }
 0x116   :  { %v143_v22 = vpop.f32.mrb[1].mxu0 }
 0x117   :  { %589 = vmatpush3.xpose.msra.mxu1 %v143_v22 }
 0x118   :  { %598 = vmatprep.subr.mxu1 %v743_v0 }
 0x119   :  { %v587_v23 = vpop.f32.mrb[0].mxu1  ;;  %v147_v24 = vpop.f32.mrb[2].mxu0 }
 0x11a   :  { %v218_v25 = vpop.f32.mrb[1].mxu1  ;;  %v149_v26 = vpop.f32.mrb[3].mxu0  ;;  %591 = vmatmul.mubr.f32.vlgmr.msra.gmra.mrb[2].mxu1 %v141_v21 }
 0x11b   :  { %594 = vmatpush3.xpose.msra.mxu0 %v149_v26  ;;  %599 = vmatpush3.msra.mxu1 %v218_v25 }
 0x11c   :  { %603 = vmatprep.subr.mxu0 %v743_v0  ;;  %600 = vmatprep.mubr.msk.f32.mxu1 %vm744_vm1, %v743_v0 }
 0x11e   :  { %596 = vmatmul.mubr.f32.vlgmr.msra.gmra.mrb[4].mxu0 %v147_v24 }
 0x11f   :  { %604 = vmatpush3.msra.mxu0 %v587_v23  ;;  %605 = vmatprep.mubr.msk.f32.mxu0 %vm744_vm1, %v743_v0 }
 0x1ed   :  { %v294_v28 = vpop.f32.mrb[2].mxu1 }
 0x1ee   :  { %v295_v29 = vadd.f32 %v294_v28, %v227_v27  ;;  %v592_v30 = vpop.f32.mrb[3].mxu1 }
 0x1f0   :  { %v369_v31 = vsel %vm368_vm2, %v295_v29, -inf }
 0x1f1   :  { %370 = vmax.xlane.f32.xlu0 %v369_v31  ;;  %v364_v32 = vpop.f32.mrb[4].mxu0 }
 0x1f2   :  { %v365_v33 = vadd.f32 %v364_v32, %v227_v27  ;;  %v597_v34 = vpop.f32.mrb[5].mxu0 }
 0x1f4   :  { %v372_v35 = vsel %vm368_vm2, %v365_v33, -inf }
 0x1f5   :  { %373 = vmax.xlane.f32.xlu0 %v372_v35 }
 0x27e   :  { %v371_v36 = vpop.xlane.xlu0 %370 }
 0x27f   :  { %v375_v37 = vsub.f32 %v295_v29, %v371_v36 }
 0x281   :  { %v377_v38 = vmul.f32 1.442695, %v375_v37 }
 0x282   :  { %v374_v39 = vpop.xlane.xlu0 %373 }
 0x283   :  { %634 = vpow2.f32 %v377_v38  ;;  %v376_v40 = vsub.f32 %v365_v33, %v374_v39 }
 0x285   :  { %v379_v41 = vmul.f32 1.442695, %v376_v40 }
 0x287   :  { %636 = vpow2.f32 %v379_v41 }
 0x28d   :  { %v635_v42 = vpop.eup %634 }
 0x28e   :  { %v381_v43 = vsel %vm368_vm2, %v635_v42, 0.0 }
 0x28f   :  { %382 = vadd.xlane.f32.xlu1 %v381_v43 }
 0x291   :  { %v637_v44 = vpop.eup %636 }
 0x292   :  { %v384_v45 = vsel %vm368_vm2, %v637_v44, 0.0 }
 0x293   :  { %385 = vadd.xlane.f32.xlu1 %v384_v45 }
 0x31c   :  { %v383_v46 = vpop.xlane.xlu1 %382 }
 0x31d   :  { %638 = vrcp.f32 %v383_v46 }
 0x320   :  { %v386_v47 = vpop.xlane.xlu1 %385 }
 0x321   :  { %640 = vrcp.f32 %v386_v47 }
 0x327   :  { %v639_v48 = vpop.eup %638 }
 0x328   :  { %v389_v49 = vmul.f32 %v639_v48, %v635_v42 }
 0x32a   :  { %601 = vmatmul.mubr.msk.f32.vlgmr.msra.gmra.mrb[4].mxu1 %vm368_vm2, %v389_v49 }
 0x32b   :  { %v641_v50 = vpop.eup %640 }
 0x32c   :  { %v390_v51 = vmul.f32 %v641_v50, %v637_v44 }
 0x32e   :  { %606 = vmatmul.mubr.msk.f32.vlgmr.msra.gmra.mrb[6].mxu0 %vm368_vm2, %v390_v51 }
 0x3fd   :  { %v460_v52 = vpop.f32.mrb[4].mxu1 }
 0x3fe   :  { %537 = vst [vmem:[#allocation8] sm:$0xff] %v460_v52  ;;  %v602_v53 = vpop.f32.mrb[5].mxu1 }
 0x401   :  { %v533_v54 = vpop.f32.mrb[6].mxu0 }
 0x402   :  { %538 = vst [vmem:[#allocation8 + $0x8] sm:$0xff] %v533_v54  ;;  %v607_v55 = vpop.f32.mrb[7].mxu0 }
 0x403   :  { %719 = shalt.err (!%p716_p0)
}
 0x404   :  { %s720_s27 = scalar_lea.hbm %s837_s3, 256 }
 0x405   :  { %p721_p1 = scmp.ne.s32.totalorder %s837_s3, %s720_s27  ;;  %p724_p2 = scmp.lt.u32.totalorder %s720_s27, %s837_s3 }
 0x407   :  { %p726_p3 = pnand %p724_p2, %p721_p1 }
 0x409   :  { %729 = shalt.err (!%p726_p3)
}
 0x40a   :  { %550 = dma.vmem_to_hbm [thread:$0]  %s545_s23, 256, %s837_s3, [#allocation4], %s740_s1, %s740_s1, %s741_s9  }
 0x40b   :  { %734 = dma.done.wait [#allocation4], 256  }
 0x40c   :  { %735 = vsyncadd [#allocation4], 4294967040 }
 0x40d   :  { %554 = vsyncpa [#allocation3], 1 }
 0x40e   :  { %555 = vsyncpa [#allocation6], 1 }
 0x40f   :  { %556 = vsyncpa [#allocation4], 1 }

</bundles_post_ra>
